<compile_context>
chip_gen: v6e
topology: v6e:2x2x1
jax: 0.10.0
libtpu: 0.0.40
codegen_flags: <defaults>
</compile_context>

<pallas_src>
import numpy as np

import jax
import jax.numpy as jnp
from jax.experimental import pallas as pl
from jax.experimental.pallas import tpu as pltpu


# ---------------------------------------------------------------- helpers ---
def _round_up(x, m):
    return (x + m - 1) // m * m


# ----------------------------------------------------------------- kernel ---
def _contrast_kernel(v1_ref, v2_ref, w1_ref, b1_ref, w2_ref, b2_ref,
                     g_ref, bt_ref, o_ref):
    v1 = v1_ref[0]                       # (TL, D) f32
    v2 = v2_ref[0]                       # (TL, D) f32
    h = v1 * v2                          # elementwise product, f32 (VPU)

    # conv1 (kernel_size=1) == per-position linear D -> Dh, then ReLU.
    # bf16 operands on the MXU, f32 accumulation.
    h1 = jnp.dot(h.astype(jnp.bfloat16), w1_ref[...],
                 preferred_element_type=jnp.float32) + b1_ref[...]
    h1 = jnp.maximum(h1, 0.0)

    # conv2 (kernel_size=1) == per-position linear Dh -> D.
    h2 = jnp.dot(h1.astype(jnp.bfloat16), w2_ref[...],
                 preferred_element_type=jnp.float32) + b2_ref[...]

    # LayerNorm over D with eps = 1e-6 (matches nn.LayerNorm(dim, eps=1e-06)), f32.
    mu = jnp.mean(h2, axis=-1, keepdims=True)
    var = jnp.mean(jnp.square(h2 - mu), axis=-1, keepdims=True)
    ln = (h2 - mu) * jax.lax.rsqrt(var + 1e-6) * g_ref[...] + bt_ref[...]

    # sigmoid (f32) and gate by the original v_1.
    sig = 1.0 / (1.0 + jnp.exp(-ln))
    o_ref[0] = sig * v1


# ---------------------------------------------------------------- wrapper ---
def contrast_block(v1, v2, params, *, block_l=None):
    """v1, v2: (B, L, D) float32 activations (the layout the PyTorch module
    receives before its internal transposes). Returns (B, L, D) float32."""
    B, L, D = v1.shape
    Dh = params["w1"].shape[1]

    # Sequence tile: bounded live set + lane/sublane-friendly block shapes.
    if block_l is None:
        block_l = 256
    block_l = min(block_l, _round_up(L, 8))
    Lp = _round_up(L, block_l)
    if Lp != L:
        pad = ((0, 0), (0, Lp - L), (0, 0))
        v1p = jnp.pad(v1, pad)
        v2p = jnp.pad(v2, pad)
    else:
        v1p, v2p = v1, v2
    n_l = Lp // block_l

    # Weights in bf16 (MXU operands); everything elementwise stays f32.
    w1 = params["w1"].astype(jnp.bfloat16)                     # (D, Dh)  input-major
    w2 = params["w2"].astype(jnp.bfloat16)                     # (Dh, D)
    b1 = params["b1"].reshape(1, Dh).astype(jnp.float32)
    b2 = params["b2"].reshape(1, D).astype(jnp.float32)
    g = params["gamma"].reshape(1, D).astype(jnp.float32)
    bt = params["beta"].reshape(1, D).astype(jnp.float32)

    # Explicit scoped-VMEM budget: double-buffered activation tiles + resident
    # weights (+2x slack), capped so it also fits v7x's 64 MiB physical VMEM.
    act_bytes = 3 * 2 * block_l * D * 4                        # v1, v2, out (2 buffers each)
    wgt_bytes = 2 * (2 * D * Dh * 2 + (Dh + 3 * D) * 4)        # bf16 weights + f32 vectors
    vmem_limit = int(min(max(2 * (act_bytes + wgt_bytes), 4 << 20), 64 << 20))

    out = pl.pallas_call(
        _contrast_kernel,
        out_shape=jax.ShapeDtypeStruct((B, Lp, D), jnp.float32),
        grid_spec=pltpu.PrefetchScalarGridSpec(
            num_scalar_prefetch=0,
            grid=(B, n_l),
            in_specs=[
                pl.BlockSpec((1, block_l, D), lambda b, l: (b, l, 0)),   # v_1
                pl.BlockSpec((1, block_l, D), lambda b, l: (b, l, 0)),   # v_2
                pl.BlockSpec((D, Dh), lambda b, l: (0, 0)),              # conv1 weight (in, out)
                pl.BlockSpec((1, Dh), lambda b, l: (0, 0)),              # conv1 bias
                pl.BlockSpec((Dh, D), lambda b, l: (0, 0)),              # conv2 weight (in, out)
                pl.BlockSpec((1, D), lambda b, l: (0, 0)),               # conv2 bias
                pl.BlockSpec((1, D), lambda b, l: (0, 0)),               # LN gamma
                pl.BlockSpec((1, D), lambda b, l: (0, 0)),               # LN beta
            ],
            out_specs=pl.BlockSpec((1, block_l, D), lambda b, l: (b, l, 0)),
        ),
        compiler_params=pltpu.CompilerParams(
            dimension_semantics=("parallel", "parallel"),
            vmem_limit_bytes=vmem_limit,
        ),
    )(v1p, v2p, w1, b1, w2, b2, g, bt)

    return out[:, :L, :] if Lp != L else out


# ---------------------------------------------------------- pure-JAX ref ---
def reference(v1, v2, p):
    h = v1 * v2
    h1 = jnp.maximum(jnp.einsum("bld,dh->blh", h, p["w1"]) + p["b1"], 0.0)
    h2 = jnp.einsum("blh,hd->bld", h1, p["w2"]) + p["b2"]
    mu = jnp.mean(h2, axis=-1, keepdims=True)
    var = jnp.mean(jnp.square(h2 - mu), axis=-1, keepdims=True)
    ln = (h2 - mu) * jax.lax.rsqrt(var + 1e-6) * p["gamma"] + p["beta"]
    return jax.nn.sigmoid(ln) * v1


# ------------------------------------------------------------------ setup ---
def init_params(key, D, beta):
    Dh = D // beta
    ks = jax.random.split(key, 6)

    def w(k, shape, scale=0.1):
        return (scale * jax.random.normal(k, shape)).astype(jnp.float32)

    return {
        "w1": w(ks[0], (D, Dh)),        # == conv1.weight[:, :, 0].T  (stored input-major)
        "b1": w(ks[1], (Dh,), 0.02),
        "w2": w(ks[2], (Dh, D)),        # == conv2.weight[:, :, 0].T
        "b2": w(ks[3], (D,), 0.02),
        "gamma": (jnp.ones((D,)) + 0.05 * jax.random.normal(ks[4], (D,))).astype(jnp.float32),
        "beta": w(ks[5], (D,), 0.02),
    }


if __name__ == "__main__":
    B, L, D, beta = 2, 16, 128, 4       # lane-dense D (multiple of 128), Dh = 32
    key = jax.random.PRNGKey(0)
    k1, k2, kp = jax.random.split(key, 3)

    v1 = jax.random.normal(k1, (B, L, D), dtype=jnp.float32)
    v2 = jax.random.normal(k2, (B, L, D), dtype=jnp.float32)
    params = init_params(kp, D, beta)

    out = contrast_block(v1, v2, params, block_l=8)   # grid = (2, 2)
    out = jax.block_until_ready(out)

    ref = reference(v1, v2, params)
    # Tolerance covers the bf16 MXU operands (f32 accumulation) vs the f32 reference.
    np.testing.assert_allclose(np.asarray(out), np.asarray(ref), atol=3e-2, rtol=3e-2)

    print("KERNEL_OK")
</pallas_src>

<mosaic_0001>
module attributes {stable_mosaic.version = 11 : i64} {
  func.func @_contrast_kernel(%arg0: i32, %arg1: i32, %arg2: memref<1x8x128xf32, #tpu.memory_space<vmem>>, %arg3: memref<1x8x128xf32, #tpu.memory_space<vmem>>, %arg4: memref<128x32xbf16, #tpu.memory_space<vmem>>, %arg5: memref<1x32xf32, #tpu.memory_space<vmem>>, %arg6: memref<32x128xbf16, #tpu.memory_space<vmem>>, %arg7: memref<1x128xf32, #tpu.memory_space<vmem>>, %arg8: memref<1x128xf32, #tpu.memory_space<vmem>>, %arg9: memref<1x128xf32, #tpu.memory_space<vmem>>, %arg10: memref<1x8x128xf32, #tpu.memory_space<vmem>>) attributes {dimension_semantics = [#tpu.dimension_semantics<parallel>, #tpu.dimension_semantics<parallel>], iteration_bounds = array<i64: 2, 2>, scalar_prefetch = 0 : i64, scratch_operands = 0 : i64, tpu.core_type = #tpu.core_type<tc>, window_params = [{transform_indices = @transform_0, window_bounds = array<i64: 1, 8, 128>}, {transform_indices = @transform_1, window_bounds = array<i64: 1, 8, 128>}, {pipeline_mode = #tpu.pipeline_mode<synchronous>, transform_indices = @transform_2, window_bounds = array<i64: 128, 32>}, {pipeline_mode = #tpu.pipeline_mode<synchronous>, transform_indices = @transform_3, window_bounds = array<i64: 1, 32>}, {pipeline_mode = #tpu.pipeline_mode<synchronous>, transform_indices = @transform_4, window_bounds = array<i64: 32, 128>}, {pipeline_mode = #tpu.pipeline_mode<synchronous>, transform_indices = @transform_5, window_bounds = array<i64: 1, 128>}, {pipeline_mode = #tpu.pipeline_mode<synchronous>, transform_indices = @transform_6, window_bounds = array<i64: 1, 128>}, {pipeline_mode = #tpu.pipeline_mode<synchronous>, transform_indices = @transform_7, window_bounds = array<i64: 1, 128>}, {transform_indices = @transform_8, window_bounds = array<i64: 1, 8, 128>}]} {
    %c0 = arith.constant 0 : index
    %c0_0 = arith.constant 0 : index
    %c0_1 = arith.constant 0 : index
    %0 = vector.load %arg2[%c0, %c0_0, %c0_1] : memref<1x8x128xf32, #tpu.memory_space<vmem>>, vector<1x8x128xf32>
    %1 = vector.shape_cast %0 : vector<1x8x128xf32> to vector<8x128xf32>
    %c0_2 = arith.constant 0 : index
    %c0_3 = arith.constant 0 : index
    %c0_4 = arith.constant 0 : index
    %2 = vector.load %arg3[%c0_2, %c0_3, %c0_4] : memref<1x8x128xf32, #tpu.memory_space<vmem>>, vector<1x8x128xf32>
    %3 = vector.shape_cast %2 : vector<1x8x128xf32> to vector<8x128xf32>
    %4 = arith.mulf %1, %3 : vector<8x128xf32>
    %5 = arith.truncf %4 : vector<8x128xf32> to vector<8x128xbf16>
    %c0_5 = arith.constant 0 : index
    %c0_6 = arith.constant 0 : index
    %6 = vector.load %arg4[%c0_5, %c0_6] : memref<128x32xbf16, #tpu.memory_space<vmem>>, vector<128x32xbf16>
    %cst = arith.constant dense<0.000000e+00> : vector<8x32xf32>
    %7 = tpu.matmul %5, %6, %cst {dimension_numbers = #tpu.dot_dimension_numbers<[1], [0], [0], [1], [0, 0, 1, 1], [], []>} : vector<8x128xbf16>, vector<128x32xbf16>, vector<8x32xf32> -> vector<8x32xf32>
    %c0_7 = arith.constant 0 : index
    %c0_8 = arith.constant 0 : index
    %8 = vector.load %arg5[%c0_7, %c0_8] : memref<1x32xf32, #tpu.memory_space<vmem>>, vector<1x32xf32>
    %9 = vector.broadcast %8 : vector<1x32xf32> to vector<8x32xf32>
    %10 = arith.addf %7, %9 : vector<8x32xf32>
    %cst_9 = arith.constant 0.000000e+00 : f32
    %11 = vector.broadcast %cst_9 : f32 to vector<8x32xf32>
    %12 = arith.maximumf %10, %11 : vector<8x32xf32>
    %13 = arith.truncf %12 : vector<8x32xf32> to vector<8x32xbf16>
    %c0_10 = arith.constant 0 : index
    %c0_11 = arith.constant 0 : index
    %14 = vector.load %arg6[%c0_10, %c0_11] : memref<32x128xbf16, #tpu.memory_space<vmem>>, vector<32x128xbf16>
    %cst_12 = arith.constant dense<0.000000e+00> : vector<8x128xf32>
    %15 = tpu.matmul %13, %14, %cst_12 {dimension_numbers = #tpu.dot_dimension_numbers<[1], [0], [0], [1], [0, 0, 1, 1], [], []>} : vector<8x32xbf16>, vector<32x128xbf16>, vector<8x128xf32> -> vector<8x128xf32>
    %c0_13 = arith.constant 0 : index
    %c0_14 = arith.constant 0 : index
    %16 = vector.load %arg7[%c0_13, %c0_14] : memref<1x128xf32, #tpu.memory_space<vmem>>, vector<1x128xf32>
    %17 = vector.broadcast %16 : vector<1x128xf32> to vector<8x128xf32>
    %18 = arith.addf %15, %17 : vector<8x128xf32>
    %cst_15 = arith.constant dense<0.000000e+00> : vector<8xf32>
    %19 = vector.multi_reduction <add>, %18, %cst_15 [1] : vector<8x128xf32> to vector<8xf32>
    %20 = vector.shape_cast %19 : vector<8xf32> to vector<8x1xf32>
    %cst_16 = arith.constant 1.280000e+02 : f32
    %21 = vector.broadcast %cst_16 : f32 to vector<8x1xf32>
    %22 = arith.divf %20, %21 : vector<8x1xf32>
    %23 = vector.broadcast %22 : vector<8x1xf32> to vector<8x128xf32>
    %24 = arith.subf %18, %23 : vector<8x128xf32>
    %25 = arith.mulf %24, %24 : vector<8x128xf32>
    %cst_17 = arith.constant dense<0.000000e+00> : vector<8xf32>
    %26 = vector.multi_reduction <add>, %25, %cst_17 [1] : vector<8x128xf32> to vector<8xf32>
    %27 = vector.shape_cast %26 : vector<8xf32> to vector<8x1xf32>
    %cst_18 = arith.constant 1.280000e+02 : f32
    %28 = vector.broadcast %cst_18 : f32 to vector<8x1xf32>
    %29 = arith.divf %27, %28 : vector<8x1xf32>
    %30 = vector.broadcast %22 : vector<8x1xf32> to vector<8x128xf32>
    %31 = arith.subf %18, %30 : vector<8x128xf32>
    %cst_19 = arith.constant 9.99999997E-7 : f32
    %32 = vector.broadcast %cst_19 : f32 to vector<8x1xf32>
    %33 = arith.addf %29, %32 : vector<8x1xf32>
    %34 = math.rsqrt %33 : vector<8x1xf32>
    %35 = vector.broadcast %34 : vector<8x1xf32> to vector<8x128xf32>
    %36 = arith.mulf %31, %35 : vector<8x128xf32>
    %c0_20 = arith.constant 0 : index
    %c0_21 = arith.constant 0 : index
    %37 = vector.load %arg8[%c0_20, %c0_21] : memref<1x128xf32, #tpu.memory_space<vmem>>, vector<1x128xf32>
    %38 = vector.broadcast %37 : vector<1x128xf32> to vector<8x128xf32>
    %39 = arith.mulf %36, %38 : vector<8x128xf32>
    %c0_22 = arith.constant 0 : index
    %c0_23 = arith.constant 0 : index
    %40 = vector.load %arg9[%c0_22, %c0_23] : memref<1x128xf32, #tpu.memory_space<vmem>>, vector<1x128xf32>
    %41 = vector.broadcast %40 : vector<1x128xf32> to vector<8x128xf32>
    %42 = arith.addf %39, %41 : vector<8x128xf32>
    %cst_24 = arith.constant 0.000000e+00 : f32
    %43 = vector.broadcast %cst_24 : f32 to vector<8x128xf32>
    %44 = arith.subf %43, %42 : vector<8x128xf32>
    %45 = math.exp %44 : vector<8x128xf32>
    %cst_25 = arith.constant 1.000000e+00 : f32
    %46 = vector.broadcast %cst_25 : f32 to vector<8x128xf32>
    %47 = arith.addf %46, %45 : vector<8x128xf32>
    %cst_26 = arith.constant 1.000000e+00 : f32
    %48 = vector.broadcast %cst_26 : f32 to vector<8x128xf32>
    %49 = arith.divf %48, %47 : vector<8x128xf32>
    %50 = arith.mulf %49, %1 : vector<8x128xf32>
    %c0_27 = arith.constant 0 : index
    %c0_28 = arith.constant 0 : index
    %c0_29 = arith.constant 0 : index
    %51 = vector.load %arg10[%c0_27, %c0_28, %c0_29] : memref<1x8x128xf32, #tpu.memory_space<vmem>>, vector<1x8x128xf32>
    %52 = vector.shape_cast %51 : vector<1x8x128xf32> to vector<8x128xf32>
    %53 = vector.shape_cast %50 : vector<8x128xf32> to vector<1x8x128xf32>
    tpu.vector_store %arg10[%c0_27, %c0_28, %c0_29], %53 {strides = array<i32>} : memref<1x8x128xf32, #tpu.memory_space<vmem>>, vector<1x8x128xf32>,
    return
  }
  func.func @transform_0(%arg0: i32, %arg1: i32) -> (i32, i32, i32) {
    %c0_i32 = arith.constant 0 : i32
    %c0_i32_0 = arith.constant 0 : i32
    return %arg0, %arg1, %c0_i32 : i32, i32, i32
  }
  func.func @transform_1(%arg0: i32, %arg1: i32) -> (i32, i32, i32) {
    %c0_i32 = arith.constant 0 : i32
    %c0_i32_0 = arith.constant 0 : i32
    return %arg0, %arg1, %c0_i32 : i32, i32, i32
  }
  func.func @transform_2(%arg0: i32, %arg1: i32) -> (i32, i32) {
    %c0_i32 = arith.constant 0 : i32
    %c0_i32_0 = arith.constant 0 : i32
    %c0_i32_1 = arith.constant 0 : i32
    return %c0_i32, %c0_i32_0 : i32, i32
  }
  func.func @transform_3(%arg0: i32, %arg1: i32) -> (i32, i32) {
    %c0_i32 = arith.constant 0 : i32
    %c0_i32_0 = arith.constant 0 : i32
    %c0_i32_1 = arith.constant 0 : i32
    return %c0_i32, %c0_i32_0 : i32, i32
  }
  func.func @transform_4(%arg0: i32, %arg1: i32) -> (i32, i32) {
    %c0_i32 = arith.constant 0 : i32
    %c0_i32_0 = arith.constant 0 : i32
    %c0_i32_1 = arith.constant 0 : i32
    return %c0_i32, %c0_i32_0 : i32, i32
  }
  func.func @transform_5(%arg0: i32, %arg1: i32) -> (i32, i32) {
    %c0_i32 = arith.constant 0 : i32
    %c0_i32_0 = arith.constant 0 : i32
    %c0_i32_1 = arith.constant 0 : i32
    return %c0_i32, %c0_i32_0 : i32, i32
  }
  func.func @transform_6(%arg0: i32, %arg1: i32) -> (i32, i32) {
    %c0_i32 = arith.constant 0 : i32
    %c0_i32_0 = arith.constant 0 : i32
    %c0_i32_1 = arith.constant 0 : i32
    return %c0_i32, %c0_i32_0 : i32, i32
  }
  func.func @transform_7(%arg0: i32, %arg1: i32) -> (i32, i32) {
    %c0_i32 = arith.constant 0 : i32
    %c0_i32_0 = arith.constant 0 : i32
    %c0_i32_1 = arith.constant 0 : i32
    return %c0_i32, %c0_i32_0 : i32, i32
  }
  func.func @transform_8(%arg0: i32, %arg1: i32) -> (i32, i32, i32) {
    %c0_i32 = arith.constant 0 : i32
    %c0_i32_0 = arith.constant 0 : i32
    return %arg0, %arg1, %c0_i32 : i32, i32, i32
  }
}

</mosaic_0001>

<bundles_post_ra>
// kernel: tpu_custom_call.1
= control target key start
LH: loop header
LB: loop body
LE: loop exit
PB: predicated region body
PF: predicated region fallthrough
CT: control target
= control target key end

     0   :  { %13 = vsyncpa [#allocation3], 0  ;;  %s1163_s0 = inlined_call_operand.vmem [shape: f32[2,16,128], index: 0, kind: input, shape index: {}]   ;;  %s1164_s1 = inlined_call_operand.vmem [shape: f32[2,16,128], index: 1, kind: input, shape index: {}]   ;;  %s1165_s2 = inlined_call_operand.vmem [shape: bf16[128,32], index: 2, kind: input, shape index: {}]   ;;  %s1166_s3 = inlined_call_operand.vmem [shape: f32[1,32], index: 3, kind: input, shape index: {}]   ;;  %s1167_s4 = inlined_call_operand.vmem [shape: bf16[32,128], index: 4, kind: input, shape index: {}]   ;;  %s1168_s5 = inlined_call_operand.vmem [shape: f32[1,128], index: 5, kind: input, shape index: {}]   ;;  %s1169_s6 = inlined_call_operand.vmem [shape: f32[1,128], index: 6, kind: input, shape index: {}]   ;;  %s1170_s7 = inlined_call_operand.vmem [shape: f32[1,128], index: 7, kind: input, shape index: {}]   ;;  %s1171_s8 = inlined_call_operand.hbm [shape: f32[2,16,128], index: 8, kind: output, shape index: {}]  }
   0x1   :  { %15 = vsyncpa [#allocation3 + $0x1], 0  ;;  %s994_s27 = smov 0   ;;  %s996_s28 = smov 0  }
   0x2   :  { %s998_s29 = smov 0   ;;  %s1000_s30 = smov 0  }
   0x3   :  { %s1002_s9 = smov 0   ;;  %s1004_s10 = smov 0  }
   0x4   :  { %s1006_s11 = smov 0   ;;  %s1008_s12 = smov 0  }
   0x5 LB: > { %1176 = sst [smem:[#allocation5_spill]] %s936_s10  ;;  %s693_s13 = sadd.s32 4294967295, %s944_s12   ;;  %s944_s12 = sphi %s1008_s12, %s21_s12   ;;  %s940_s11 = sphi %s1006_s11, %s1185_s11   ;;  %s936_s10 = sphi %s1004_s10, %s1184_s10   ;;  %s932_s9 = sphi %s1002_s9, %s1183_s9   ;;  %s928_s30 = sphi %s1000_s30, %s1182_s30   ;;  %s924_s29 = sphi %s998_s29, %s1188_s29   ;;  %s920_s28 = sphi %s996_s28, %s1187_s28   ;;  %s916_s27 = sphi %s994_s27, %s1186_s27  }
   0x6   : > { %1177 = sst [smem:[#allocation6_spill]] %s940_s11  ;;  %s694_s14 = sadd.s32 4294967294, %s944_s12  }
   0x7   : > { %s30_s15 = sadd.s32 1, %s936_s10  ;;  %s33_s16 = sadd.s32 1, %s940_s11 }
   0x8   : > { %p31_p0 = scmp.ge.s32.totalorder %s30_s15, 2  ;;  %p234_p1 = scmp.ne.s32.totalorder %s924_s29, %s920_s28 }
   0x9   : > { %p235_p2 = scmp.eq.s32.totalorder %s693_s13, 3  ;;  %p240_p5 = scmp.ne.s32.totalorder %s920_s28, %s916_s27 }
   0xa   : > { %s1190_s15 = smov (%p31_p0, %s30_s15), 0  ;;  %s1192_s16 = smov (!%p31_p0, %s33_s16), %s940_s11 }
   0xb   : > { %1178 = sst [smem:[#allocation7_spill]] %s1190_s15  ;;  %s220_s17 = ssub.s32 %s936_s10, %s1190_s15 }
   0xc   : > { %p1045_p3 = por %p235_p2, %p234_p1  ;;  %p35_p4 = scmp.ge.s32.totalorder %s1192_s16, 2 }
   0xd   : > { %p241_p6 = scmp.eq.s32.totalorder %s694_s14, 3  ;;  %p697_p7 = scmp.ge.s32.totalorder %s944_s12, 1 }
   0xe   : > { %s1194_s16 = smov (%p35_p4, %s1192_s16), 0  ;;  %p299_p9 = scmp.lt.s32.totalorder %s944_s12, 5 }
   0xf   : > { %1180 = sst [smem:[#allocation8_spill]] %s1194_s16  ;;  %p1054_p8 = por %p241_p6, %p240_p5 }
  0x10   : > { %s219_s20 = ssub.s32 %s940_s11, %s1194_s16  ;;  %s224_s21 = sadd.s32 1, %s924_s29 }
  0x11   : > { %s221_s22 = sor.u32 %s220_s17, %s219_s20  ;;  %p300_p10 = pnand %p697_p7, %p299_p9 }
  0x12   : > { %p222_p11 = scmp.eq.s32.totalorder %s221_s22, 0  ;;  %p344_p12 = scmp.lt.s32.totalorder (!%p300_p10), %s932_s9, 1 }
  0x13   : > { %303 = sbr.rel (%p300_p10) target bundleno = 806 (0x326), region = 52  ;;  %p346_p13 = scmp.lt.s32.totalorder (!%p300_p10), %s928_s30, 1 }
  0x14   : > { %s1063_s23 = scalar_select %p222_p11, %s924_s29, %s224_s21  }
  0x15   : > { %s341_s13 = sand.u32 (!%p300_p10), 1, %s920_s28   ;;  %s719_s11 = sshll.u32 (!%p300_p10), %s932_s9, 1 }
  0x16   : > { %s698_s10 = sshll.u32 (!%p300_p10), %s341_s13, 3 }
  0x17   : > { %s343_s17 = scalar_lea.vmem (!%p300_p10), [#allocation2], %s698_s10 }
  0x18   : > { %v836_v0 = vld [vmem:[%s1165_s2 + $0x38] sm:$0xff]   ;;  %v946_v1 = vmov 0.0   ;;  %v837_v2 = vld [vmem:[%s1165_s2 + $0x30] sm:$0xff]   ;;  %vm947_vm0 = vmmov 0   ;;  %v838_v3 = vld [vmem:[%s1165_s2 + $0x28] sm:$0xff]   ;;  %s345_s20 = scalar_select %p344_p12, %s932_s9, 1 }
  0x19   : > { %735 = vmatprep.subr.bf16.mxu0 %v946_v1  ;;  %755 = vmatprep.subr.bf16.mxu1 %v946_v1  ;;  %s347_s21 = scalar_select %p346_p13, %s928_s30, 1  ;;  %v839_v4 = vld [vmem:[%s1165_s2 + $0x20] sm:$0xff]   ;;  %v840_v5 = vld [vmem:[%s1165_s2 + $0x18] sm:$0xff]   ;;  %v841_v6 = vld [vmem:[%s1165_s2 + $0x10] sm:$0xff]   ;;  %vm501_vm1 = vcmask 261120  }
  0x1a   : > { %736 = vmatpush3.bf16.msra.mxu0 %v836_v0  ;;  %751 = vmatprep.mubr.msk.bf16.mxu0 %vm947_vm0, %v946_v1  ;;  %s699_s25 = sshll.u32 %s345_s20, 1  ;;  %v842_v7 = vld [vmem:[%s1165_s2 + $0x8] sm:$0xff]   ;;  %v843_v11 = vld [vmem:[%s1165_s2] sm:$0xff]  }
  0x1b   : > { %737 = vmatprep.subr.bf16.mxu0 %v946_v1  ;;  %759 = vmatprep.mubr.msk.bf16.mxu1 %vm947_vm0, %v946_v1  ;;  %s349_s26 = sadd.s32 %s699_s25, %s347_s21  ;;  %v844_v13 = vld [vmem:[%s1167_s4 + $0x8] sm:$0xff]   ;;  %v845_v14 = vld [vmem:[%s1167_s4] sm:$0xff]   ;;  %s582_s25 = scalar_lea.sflag [#allocation3], %s341_s13 }
  0x1c   : > { %s700_s15 = sshll.u32 %s349_s26, 3  ;;  %756 = vmatpush3.bf16.msra.mxu1 %v844_v13  ;;  %v703_v15 = vld [vmem:[%s1166_s3] ss:$0 sm:$0xff]  ;;  %s948_s26 = smov [#allocation2]  }
  0x1d   : > { %s351_s22 = scalar_lea.vmem %s1163_s0, %s700_s15  ;;  %s359_s21 = scalar_lea.vmem %s1164_s1, %s700_s15  ;;  %757 = vmatprep.subr.bf16.mxu1 %v946_v1  ;;  %v712_v23 = vld [vmem:[%s1168_s5] ss:$0 sm:$0xff] }
  0x1e   : > { %738 = vmatpush3.bf16.msra.mxu0 %v837_v2  ;;  %v361_v8 = vld [vmem:[%s351_s22] sm:$0xff]  ;;  %s593_s15 = sadd.s32 %s928_s30, %s719_s11  ;;  %s597_s22 = sshll.u32 %s343_s17, 4  ;;  %s598_s22 = int_to_ptr.vmem [resolvable:$true] %s597_s22 }
  0x1f   : > { %739 = vmatprep.subr.bf16.mxu0 %v946_v1  ;;  %v362_v9 = vld [vmem:[%s359_s21] sm:$0xff]  ;;  %s720_s14 = sshll.u32 %s593_s15, 7  ;;  %s852_s16 = scalar_lea.vmem %s598_s22, 128 }
  0x20   : > { %v363_v10 = vmul.f32 %v362_v9, %v361_v8  ;;  %758 = vmatpush3.bf16.msra.mxu1 %v845_v14  ;;  %v716_v37 = vld [vmem:[%s1169_s6] ss:$0 sm:$0xff]  ;;  %s595_s21 = scalar_lea.hbm %s1171_s8, %s720_s14  ;;  %p853_p0 = scmp.ne.s32.totalorder %s598_s22, %s852_s16 }
  0x21   : > { %v717_v39 = vld [vmem:[%s1170_s7] ss:$0 sm:$0xff]  ;;  %s856_s9 = sshll.u32 %s948_s26, 4  ;;  %s857_s9 = int_to_ptr.vmem [resolvable:$false] %s856_s9 }
  0x22   : > { %740 = vmatpush3.bf16.msra.mxu0 %v838_v3  ;;  %v364_v12 = vpack.c.bf16 %v363_v10, %v363_v10  ;;  %p854_p1 = pnand %p853_p0, %p1045_p3  ;;  %s858_s30 = scalar_lea.vmem %s857_s9, 256 }
  0x23   : > { %741 = vmatprep.subr.bf16.mxu0 %v946_v1  ;;  %p859_p4 = scmp.lt.s32.totalorder %s598_s22, %s857_s9  ;;  %p860_p5 = scmp.lt.s32.totalorder %s858_s30, %s852_s16 }
  0x24   : > { %p855_p2 = pneg %p854_p1 }
  0x25   : > { %p861_p6 = por %p860_p5, %p859_p4 }
  0x26   : > { %742 = vmatpush3.bf16.msra.mxu0 %v839_v4 }
  0x27   : > { %743 = vmatprep.subr.bf16.mxu0 %v946_v1  ;;  %p862_p7 = pnand %p861_p6, %p855_p2 }
  0x2a   : > { %744 = vmatpush3.bf16.msra.mxu0 %v840_v5 }
  0x2b   : > { %745 = vmatprep.subr.bf16.mxu0 %v946_v1 }
  0x2e   : > { %746 = vmatpush3.bf16.msra.mxu0 %v841_v6 }
  0x2f   : > { %747 = vmatprep.subr.bf16.mxu0 %v946_v1 }
  0x32   : > { %748 = vmatpush3.bf16.msra.mxu0 %v842_v7 }
  0x33   : > { %749 = vmatprep.subr.bf16.mxu0 %v946_v1 }
  0x36   : > { %750 = vmatpush3.bf16.msra.mxu0 %v843_v11 }
  0x39   : > { %752 = vmatmul.mubr.bf16.vlgmr.msra.gmra.mxu0 %v364_v12 }
  0xf9   : > { %v470_v16 = vpop.f32.mrf.mxu0 }
  0xfa   : > { %v471_v17 = vadd.f32 %v703_v15, %v470_v16 }
  0xfb   : > { %v753_v18 = vpop.f32.mrf.mxu0 }
  0xfc   : > { %v476_v19 = vmax.f32 %v471_v17, 0.0 }
  0xfd   : > { %v473_v20 = vpop.f32.mrf.mxu0 }
  0xfe   : > { %v477_v21 = vpack.c.bf16 %v476_v19, %v476_v19 }
  0xff   : > { %v754_v22 = vpop.f32.mrf.mxu0 }
 0x100   : > { %760 = vmatmul.mubr.msk.bf16.vlgmr.msra.gmra.mxu1 %vm501_vm1, %v477_v21 }
 0x1c0   : > { %v539_v24 = vpop.f32.mrf.mxu1 }
 0x1c1   : > { %v540_v25 = vadd.f32 %v712_v23, %v539_v24 }
 0x1c2   : > { %v761_v26 = vpop.f32.mrf.mxu1 }
 0x1c3   : > { %545 = vadd.xlane.f32.xlu0 %v540_v25 }
 0x1c4   : > { %v542_v27 = vpop.f32.mrf.mxu1 }
 0x1c6   : > { %v762_v28 = vpop.f32.mrf.mxu1 }
 0x24c   : > { %v546_v29 = vpop.xlane.xlu0 %545 }
 0x24d   : > { %v548_v30 = vmul.f32 0.0078125, %v546_v29 }
 0x24f   : > { %v549_v31 = vsub.f32 %v540_v25, %v548_v30 }
 0x251   : > { %v550_v32 = vmul.f32 %v549_v31, %v549_v31 }
 0x253   : > { %551 = vadd.xlane.f32.xlu0 %v550_v32 }
 0x2dc   : > { %v552_v33 = vpop.xlane.xlu0 %551 }
 0x2dd   : > { %v553_v34 = vmul.f32 0.0078125, %v552_v33 }
 0x2df   : > { %v554_v35 = vadd.f32 1e-06, %v553_v34 }
 0x2e1   : > { %846 = vrsqrt.f32 %v554_v35 }
 0x2ee   : > { %v847_v36 = vpop.eup %846 }
 0x2ef   : > { %v556_v38 = vmul.f32 %v847_v36, %v549_v31 }
 0x2f1   : > { %v564_v40 = vmul.f32 %v716_v37, %v556_v38 }
 0x2f3   : > { %v572_v41 = vadd.f32 %v717_v39, %v564_v40 }
 0x2f5   : > { %v573_v42 = vsub.f32 0.0, %v572_v41 }
 0x2f7   : > { %v574_v43 = vmul.f32 1.442695, %v573_v42 }
 0x2f9   : > { %848 = vpow2.f32 %v574_v43 }
 0x306   : > { %v849_v44 = vpop.eup %848 }
 0x307   : > { %v576_v45 = vadd.f32 1.0, %v849_v44 }
 0x309   : > { %850 = vrcp.f32 %v576_v45 }
 0x316   : > { %v851_v46 = vpop.eup %850 }
 0x317   : > { %v579_v47 = vmul.f32 %v851_v46, %v361_v8 }
 0x319   : > { %580 = vst [vmem:[%s343_s17] sm:$0xff] %v579_v47 }
 0x31a   : > { %865 = shalt.err (!%p862_p7)
}
 0x31b   : > { %s866_s10 = scalar_lea.hbm %s595_s21, 128  ;;  %s870_s15 = scalar_lea.hbm %s1171_s8, 512 }
 0x31c   : > { %p867_p9 = scmp.ne.s32.totalorder %s595_s21, %s866_s10  ;;  %p871_p12 = scmp.lt.s32.totalorder %s595_s21, %s1171_s8 }
 0x31d   : > { %p872_p13 = scmp.lt.s32.totalorder %s870_s15, %s866_s10 }
 0x31e   : > { %p868_p10 = pnand %p867_p9, %p1045_p3 }
 0x31f   : > { %p873_p0 = por %p872_p13, %p871_p12 }
 0x320   : > { %p869_p11 = pneg %p868_p10 }
 0x322   : > { %p874_p1 = pnand %p873_p0, %p869_p11 }
 0x324   : > { %877 = shalt.err (!%p874_p1)
}
 0x325   : > { %763 = dma.vmem_to_hbm [thread:$0]  (%p1045_p3), %s598_s22, 128, %s595_s21, %s582_s25  }
 0x326 PF: > { %p769_p2 = scmp.ge.s32.totalorder %s944_s12, 2  ;;  %s609_s20 = sand.u32 1, %s916_s27  }
 0x327   : > { %s610_s24 = scalar_lea.sflag [#allocation3], %s609_s20 }
 0x328   : > { %p766_p4 = pnand %p769_p2, %p1054_p8 }
 0x32a   : > { %p767_p5 = pneg %p766_p4 }
 0x32c   : > { %911 = dma.done.wait (%p767_p5), %s610_s24, 128  }
 0x32d   : > { %913 = vsyncadd (%p767_p5), %s610_s24, 4294967168  ;;  %s21_s12 = sadd.s32 1, %s944_s12   ;;  %s1182_s30 = sld [smem:[#allocation5_spill]] }
 0x32e   : > { %p18_p6 = scmp.ge.s32.totalorder %s21_s12, 6   ;;  %s1183_s9 = sld [smem:[#allocation6_spill]] }
 0x32f   : > { %s1184_s10 = sld [smem:[#allocation7_spill]]  ;;  %s1186_s27 = smov %s920_s28 }
 0x330   : > { %s1185_s11 = sld [smem:[#allocation8_spill]]  ;;  %s1187_s28 = smov %s924_s29 }
 0x331   : > { %s1188_s29 = smov %s1063_s23  ;;  %20 = sbr.rel (!%p18_p6) target bundleno = 5 (0x5), region = 90 }
 0x336   :  { %615 = vsyncpa [#allocation3], 1 }
 0x337   :  { %617 = vsyncpa [#allocation3 + $0x1], 1 }

</bundles_post_ra>
